<compile_context>
chip_gen: v7x
topology: tpu7x:2x2x1
jax: 0.10.0
libtpu: 0.0.40
codegen_flags: <defaults>
</compile_context>

<pallas_src>
import jax
import jax.numpy as jnp
import numpy as np
from jax.experimental import pallas as pl
from jax.experimental.pallas import tpu as pltpu


def conv1x1_kernel(w_ref, b_ref, x_ref, o_ref):
    # w_ref : VMEM (C_out, C_in)
    # b_ref : VMEM (C_out, 1)
    # x_ref : VMEM (C_in, T)    lane-dense spatial tile (batch dim squeezed)
    # o_ref : VMEM (C_out, T)
    y = jnp.dot(
        w_ref[...],
        x_ref[...],
        preferred_element_type=jnp.float32,
        precision=jax.lax.Precision.HIGHEST,
    )                                              # (C_out, T) f32 accum
    y = y + b_ref[...].astype(jnp.float32)         # bias broadcast over lanes
    o_ref[...] = y.astype(o_ref.dtype)


def _pick_hw_tile(hw, c_in, c_out, dtype_bytes, vmem_budget=8 * 1024 * 1024):
    """Largest lane-dense tile (multiple of 128) that divides hw and whose
    double-buffered input+output tiles fit within a conservative VMEM budget.
    Falls back to the full extent (always legal as a block shape)."""
    per_lane = (c_in + c_out) * dtype_bytes * 2    # 2x for double-buffering
    max_tile = max(128, vmem_budget // max(per_lane, 1))
    max_tile = (max_tile // 128) * 128
    if hw <= max_tile:
        return hw
    for t in range(max_tile, 127, -128):
        if hw % t == 0:
            return t
    return hw  # fallback: single full-extent tile


def conv1x1(x, conv_w, conv_b):
    """x: (B, C_in, H, W); conv_w: (C_out, C_in, 1, 1); conv_b: (C_out,)."""
    B, C_in, H, W = x.shape
    C_out = conv_w.shape[0]
    HW = H * W

    x2 = x.reshape(B, C_in, HW)                    # contiguous, free reshape
    w2 = conv_w.reshape(C_out, C_in)
    b2 = conv_b.reshape(C_out, 1)

    t_hw = _pick_hw_tile(HW, C_in, C_out, x.dtype.itemsize)
    n_hw = HW // t_hw

    out2 = pl.pallas_call(
        conv1x1_kernel,
        out_shape=jax.ShapeDtypeStruct((B, C_out, HW), x.dtype),
        grid_spec=pltpu.PrefetchScalarGridSpec(
            num_scalar_prefetch=0,
            grid=(B, n_hw),
            in_specs=[
                pl.BlockSpec((C_out, C_in), lambda b, s: (0, 0)),     # weight
                pl.BlockSpec((C_out, 1), lambda b, s: (0, 0)),        # bias
                pl.BlockSpec((pl.Squeezed(), C_in, t_hw),
                             lambda b, s: (b, 0, s)),                 # x tile
            ],
            out_specs=pl.BlockSpec((pl.Squeezed(), C_out, t_hw),
                                   lambda b, s: (b, 0, s)),
        ),
        compiler_params=pltpu.CompilerParams(
            dimension_semantics=("parallel", "parallel")),
    )(w2, b2, x2)

    return out2.reshape(B, C_out, H, W)


def conv1x1_ref(x, conv_w, conv_b):
    # Pure-JAX reference mirroring the PyTorch forward (Conv2d k=1 + bias).
    y = jax.lax.conv_general_dilated(
        x, conv_w, window_strides=(1, 1), padding="VALID",
        dimension_numbers=("NCHW", "OIHW", "NCHW"),
        precision=jax.lax.Precision.HIGHEST)
    return y + conv_b[None, :, None, None]


if __name__ == "__main__":
    key = jax.random.PRNGKey(0)
    kx, kw, kb = jax.random.split(key, 3)

    B, C_in, C_out, H, W = 2, 4, 8, 16, 16
    x = jax.random.normal(kx, (B, C_in, H, W), dtype=jnp.float32)

    # PyTorch Conv2d default init: uniform(-1/sqrt(fan_in), 1/sqrt(fan_in)).
    fan_in = C_in * 1 * 1
    bound = 1.0 / np.sqrt(fan_in)
    conv_w = jax.random.uniform(kw, (C_out, C_in, 1, 1), dtype=jnp.float32,
                                minval=-bound, maxval=bound)
    conv_b = jax.random.uniform(kb, (C_out,), dtype=jnp.float32,
                                minval=-bound, maxval=bound)

    out = conv1x1(x, conv_w, conv_b)
    out = jax.block_until_ready(out)

    ref = jax.block_until_ready(conv1x1_ref(x, conv_w, conv_b))
    np.testing.assert_allclose(np.asarray(out), np.asarray(ref),
                               rtol=1e-5, atol=2e-5)
    print("KERNEL_OK")
</pallas_src>

<mosaic_0001>
module attributes {stable_mosaic.version = 11 : i64} {
  func.func @conv1x1_kernel(%arg0: i32, %arg1: i32, %arg2: memref<8x4xf32, #tpu.memory_space<vmem>>, %arg3: memref<8x1xf32, #tpu.memory_space<vmem>>, %arg4: memref<1x4x256xf32, #tpu.memory_space<vmem>>, %arg5: memref<1x8x256xf32, #tpu.memory_space<vmem>>) attributes {dimension_semantics = [#tpu.dimension_semantics<parallel>, #tpu.dimension_semantics<parallel>], iteration_bounds = array<i64: 2, 1>, scalar_prefetch = 0 : i64, scratch_operands = 0 : i64, tpu.core_type = #tpu.core_type<tc>, window_params = [{pipeline_mode = #tpu.pipeline_mode<synchronous>, transform_indices = @transform_0, window_bounds = array<i64: 8, 4>}, {pipeline_mode = #tpu.pipeline_mode<synchronous>, transform_indices = @transform_1, window_bounds = array<i64: 8, 1>}, {transform_indices = @transform_2, window_bounds = array<i64: 1, 4, 256>}, {transform_indices = @transform_3, window_bounds = array<i64: 1, 8, 256>}]} {
    %c0 = arith.constant 0 : index
    %c0_0 = arith.constant 0 : index
    %0 = vector.load %arg2[%c0, %c0_0] : memref<8x4xf32, #tpu.memory_space<vmem>>, vector<8x4xf32>
    %c0_1 = arith.constant 0 : index
    %c0_2 = arith.constant 0 : index
    %c0_3 = arith.constant 0 : index
    %1 = vector.load %arg4[%c0_1, %c0_2, %c0_3] : memref<1x4x256xf32, #tpu.memory_space<vmem>>, vector<1x4x256xf32>
    %2 = vector.shape_cast %1 : vector<1x4x256xf32> to vector<4x256xf32>
    %cst = arith.constant dense<0.000000e+00> : vector<8x256xf32>
    %3 = tpu.matmul %0, %2, %cst {dimension_numbers = #tpu.dot_dimension_numbers<[1], [0], [0], [1], [0, 0, 1, 1], [], []>, precision = #tpu.contract_precision<fp32>} : vector<8x4xf32>, vector<4x256xf32>, vector<8x256xf32> -> vector<8x256xf32>
    %c0_4 = arith.constant 0 : index
    %c0_5 = arith.constant 0 : index
    %4 = vector.load %arg3[%c0_4, %c0_5] : memref<8x1xf32, #tpu.memory_space<vmem>>, vector<8x1xf32>
    %5 = vector.broadcast %4 : vector<8x1xf32> to vector<8x256xf32>
    %6 = arith.addf %3, %5 : vector<8x256xf32>
    %c0_6 = arith.constant 0 : index
    %c0_7 = arith.constant 0 : index
    %c0_8 = arith.constant 0 : index
    %7 = vector.load %arg5[%c0_6, %c0_7, %c0_8] : memref<1x8x256xf32, #tpu.memory_space<vmem>>, vector<1x8x256xf32>
    %8 = vector.shape_cast %7 : vector<1x8x256xf32> to vector<8x256xf32>
    %9 = vector.shape_cast %6 : vector<8x256xf32> to vector<1x8x256xf32>
    tpu.vector_store %arg5[%c0_6, %c0_7, %c0_8], %9 {strides = array<i32>} : memref<1x8x256xf32, #tpu.memory_space<vmem>>, vector<1x8x256xf32>,
    return
  }
  func.func @transform_0(%arg0: i32, %arg1: i32) -> (i32, i32) {
    %c0_i32 = arith.constant 0 : i32
    %c0_i32_0 = arith.constant 0 : i32
    %c0_i32_1 = arith.constant 0 : i32
    return %c0_i32, %c0_i32_0 : i32, i32
  }
  func.func @transform_1(%arg0: i32, %arg1: i32) -> (i32, i32) {
    %c0_i32 = arith.constant 0 : i32
    %c0_i32_0 = arith.constant 0 : i32
    %c0_i32_1 = arith.constant 0 : i32
    return %c0_i32, %c0_i32_0 : i32, i32
  }
  func.func @transform_2(%arg0: i32, %arg1: i32) -> (i32, i32, i32) {
    %c0_i32 = arith.constant 0 : i32
    %c0_i32_0 = arith.constant 0 : i32
    return %arg0, %c0_i32, %arg1 : i32, i32, i32
  }
  func.func @transform_3(%arg0: i32, %arg1: i32) -> (i32, i32, i32) {
    %c0_i32 = arith.constant 0 : i32
    %c0_i32_0 = arith.constant 0 : i32
    return %arg0, %c0_i32, %arg1 : i32, i32, i32
  }
}

</mosaic_0001>

<bundles_post_ra>
// kernel: tpu_custom_call.1
= control target key start
LH: loop header
LB: loop body
LE: loop exit
PB: predicated region body
PF: predicated region fallthrough
CT: control target
= control target key end

     0   :  { %8 = vsyncpa [#allocation3], 0  ;;  %s1086_s0 = inlined_call_operand.vmem [shape: f32[8,4], index: 0, kind: input, shape index: {}]   ;;  %s1087_s1 = inlined_call_operand.vmem [shape: f32[8,1], index: 1, kind: input, shape index: {}]   ;;  %s1088_s2 = inlined_call_operand.vmem [shape: f32[2,4,256], index: 2, kind: input, shape index: {}]   ;;  %s1089_s3 = inlined_call_operand.hbm [shape: f32[2,8,256], index: 3, kind: output, shape index: {}]  }
   0x1   :  { %10 = vsyncpa [#allocation3 + $0x1], 0  ;;  %s968_s12 = smov 0   ;;  %s970_s13 = smov 0  }
   0x2   :  { %s972_s14 = smov 0   ;;  %s974_s15 = smov 0  }
   0x3   :  { %s976_s16 = smov 0   ;;  %s978_s17 = smov 0  }
   0x4 LB: > { %s779_s18 = sadd.s32 4294967295, %s943_s17   ;;  %s780_s19 = sadd.s32 4294967294, %s943_s17   ;;  %s943_s17 = sphi %s978_s17, %s16_s17   ;;  %s939_s16 = sphi %s976_s16, %s1096_s16   ;;  %s935_s15 = sphi %s974_s15, %s1095_s15   ;;  %s931_s14 = sphi %s972_s14, %s1094_s14   ;;  %s927_s13 = sphi %s970_s13, %s1093_s13   ;;  %s923_s12 = sphi %s968_s12, %s1092_s12  }
   0x5   : > { %s28_s20 = sadd.s32 1, %s939_s16  ;;  %s107_s21 = sadd.s32 1, %s931_s14 }
   0x6   : > { %p30_p0 = scmp.ge.s32.totalorder %s28_s20, 2  ;;  %p117_p1 = scmp.ne.s32.totalorder %s931_s14, %s927_s13 }
   0x7   : > { %p118_p2 = scmp.eq.s32.totalorder %s779_s18, 1  ;;  %p123_p3 = scmp.ne.s32.totalorder %s927_s13, %s923_s12 }
   0x8   : > { %s1098_s20 = smov (%p30_p0, %s28_s20), 0  ;;  %p124_p5 = scmp.eq.s32.totalorder %s780_s19, 1 }
   0x9   : > { %p1008_p4 = por %p118_p2, %p117_p1  ;;  %s102_s23 = ssub.s32 %s939_s16, %s1098_s20 }
   0xa   : > { %p783_p6 = scmp.ge.s32.totalorder %s943_s17, 1  ;;  %p105_p7 = scmp.eq.s32.totalorder %s102_s23, 0 }
   0xb   : > { %p1015_p8 = por %p124_p5, %p123_p3  ;;  %p161_p9 = scmp.lt.s32.totalorder %s943_s17, 3 }
   0xc   : > { %s1021_s25 = scalar_select %p105_p7, %s931_s14, %s107_s21  }
   0xd   : > { %p162_p10 = pnand %p783_p6, %p161_p9 }
   0xe   : > { %p190_p11 = scmp.lt.s32.totalorder (!%p162_p10), %s935_s15, 1  ;;  %v200_v0 = vld [vmem:[%s1086_s0] sm:$0xff] (!%p162_p10)  ;;  %vm210_vm0 = vcmask (!%p162_p10), 31744   ;;  %v945_v1 = vmov (!%p162_p10), 0.0   ;;  %v946_v5 = vmov (!%p162_p10), 0   ;;  %vm214_vm1 = vcmask (!%p162_p10), 1043456  }
   0xf   : > { %165 = sbr.rel (%p162_p10) target bundleno = 281 (0x119), region = 32  ;;  %285 = vmatprep.mubr.f32.mxu1 (!%p162_p10), %v945_v1  ;;  %522 = vmatprep.mubr.f32.mxu0 (!%p162_p10), %v945_v1  ;;  %v212_v2 = vsel (!%p162_p10), %vm210_vm0, %v200_v0, 0  ;;  %v202_v3 = vld [vmem:[%s1087_s1] sm:$0xff] (!%p162_p10)  ;;  %s186_s8 = sand.u32 (!%p162_p10), 1, %s927_s13  }
  0x10   : > { %v286_v4 = vand.u32 (!%p162_p10), 4294901760, %v212_v2  ;;  %863 = vset.pattern.permute.xlu0 (!%p162_p10), %v946_v5  ;;  %s784_s9 = sshll.u32 (!%p162_p10), %s186_s8, 4  ;;  %s793_s10 = sshll.u32 (!%p162_p10), %s935_s15, 8 }
  0x11   : > { %205 = vperm.xlu0 (!%p162_p10), %863, %v202_v3   ;;  %s188_s11 = scalar_lea.vmem (!%p162_p10), [#allocation2], %s784_s9  ;;  %s1039_s23 = scalar_lea.hbm (!%p162_p10), %s1089_s3, %s793_s10 }
  0x12   : > { %v287_v6 = vsub.f32 (!%p162_p10), %v212_v2, %v286_v4  ;;  %s703_s18 = sshll.u32 (!%p162_p10), %s188_s11, 4  ;;  %s687_s26 = scalar_lea.sflag (!%p162_p10), [#allocation3], %s186_s8  ;;  %s1041_s18 = int_to_ptr.vmem [resolvable:$true] %s703_s18 }
  0x13   : > { %s865_s27 = scalar_lea.vmem (!%p162_p10), %s1041_s18, 256 }
  0x14   : > { %v288_v8 = vand.u32 (!%p162_p10), 4294901760, %v287_v6  ;;  %p866_p12 = scmp.ne.s32.totalorder (!%p162_p10), %s1041_s18, %s865_s27 }
  0x16   : > { %s191_s30 = scalar_select %p190_p11, %s935_s15, 1  ;;  %v289_v12 = vsub.f32 %v287_v6, %v288_v8 }
  0x17   : > { %p867_p13 = pnand %p866_p12, %p1008_p4  ;;  %s947_s15 = smov [#allocation2]  }
  0x18   : > { %s792_s4 = sshll.u32 %s191_s30, 3  ;;  %v290_v16 = vand.u32 4294901760, %v289_v12  ;;  %s869_s28 = sshll.u32 %s947_s15, 4  ;;  %s870_s28 = int_to_ptr.vmem [resolvable:$false] %s869_s28 }
  0x19   : > { %s197_s7 = scalar_lea.vmem %s1088_s2, %s792_s4  ;;  %p868_p0 = pneg %p867_p13 }
  0x1a   : > { %v201_v7 = vld [vmem:[%s197_s7] sm:$0xff]  ;;  %s871_s29 = scalar_lea.vmem %s870_s28, 512  ;;  %p872_p1 = scmp.lt.s32.totalorder %s1041_s18, %s870_s28 }
  0x1b   : > { %v209_v9 = vcombine.high %v201_v7, %v201_v7  ;;  %v215_v10 = vsel %vm214_vm1, %v201_v7, 0  ;;  %p873_p2 = scmp.lt.s32.totalorder %s871_s29, %s865_s27 }
  0x1c   : > { %v221_v11 = vand.u32 4294901760, %v215_v10 }
  0x1d   : > { %v217_v13 = vsel %vm214_vm1, %v209_v9, 0  ;;  %p874_p3 = por %p873_p2, %p872_p1 }
  0x1e   : > { %v219_v14 = vand.u32 4294901760, %v217_v13  ;;  %v304_v15 = vsub.f32 %v215_v10, %v221_v11 }
  0x1f   : > { %p875_p5 = pnand %p874_p3, %p868_p0 }
  0x20   : > { %220 = vmatprep.subr.mxu1 %v219_v14  ;;  %457 = vmatprep.subr.mxu0 %v219_v14  ;;  %v298_v17 = vsub.f32 %v217_v13, %v219_v14  ;;  %v305_v18 = vand.u32 4294901760, %v304_v15 }
  0x21   : > { %222 = vmatpush1.msra.mxu1 %v221_v11  ;;  %459 = vmatpush1.msra.mxu0 %v221_v11 }
  0x22   : > { %291 = vmatmul.mubr.f32.vlgmr.msra.gmra.mrb[0].mxu1 %v290_v16  ;;  %526 = vmatmul.mubr.f32.vlgmr.msra.gmra.mrb[0].mxu0 %v288_v8  ;;  %v299_v19 = vand.u32 4294901760, %v298_v17  ;;  %v306_v20 = vsub.f32 %v304_v15, %v305_v18 }
  0x23   : > { %371 = vmatprep.mubr.f32.mxu1 %v945_v1  ;;  %602 = vmatprep.mubr.f32.mxu0 %v945_v1 }
  0x24   : > { %v300_v21 = vsub.f32 %v298_v17, %v299_v19  ;;  %535 = vmatprep.subr.mxu0 %v299_v19  ;;  %v307_v22 = vand.u32 4294901760, %v306_v20 }
  0x25   : > { %539 = vmatpush1.msra.mxu0 %v305_v18 }
  0x26   : > { %v301_v23 = vand.u32 4294901760, %v300_v21  ;;  %611 = vmatprep.subr.mxu0 %v219_v14 }
  0x28   : > { %302 = vmatprep.subr.mxu1 %v301_v23 }
  0x29   : > { %308 = vmatpush1.msra.mxu1 %v307_v22 }
  0x2a   : > { %373 = vmatmul.mubr.f32.vlgmr.msra.gmra.mrb[0].mxu1 %v286_v4  ;;  %604 = vmatmul.mubr.f32.vlgmr.msra.gmra.mrb[0].mxu0 %v286_v4 }
  0x2b   : > { %381 = vmatprep.subr.mxu1 %v298_v17  ;;  %447 = vmatprep.mubr.f32.mxu1 %v945_v1 }
  0x2c   : > { %384 = vmatpush1.msra.mxu1 %v304_v15  ;;  %613 = vmatpush1.msra.mxu0 %v221_v11 }
  0x2d   : > { %676 = vmatprep.mubr.f32.mxu0 %v945_v1 }
  0x32   : > { %450 = vmatmul.mubr.f32.vlgmr.msra.gmra.mrb[0].mxu1 %v287_v6  ;;  %678 = vmatmul.mubr.f32.vlgmr.msra.gmra.mrb[0].mxu0 %v286_v4 }
  0x90   : > { %v206_v24 = vpop.permute.xlu0 %205 }
 0x105   : > { %v451_v25 = vpop.f32.mrb[0].mxu1  ;;  %v679_v26 = vpop.f32.mrb[0].mxu0 }
 0x106   : > { %v794_v27 = vadd.f32 %v451_v25, %v206_v24  ;;  %v453_v28 = vpop.f32.mrb[1].mxu1  ;;  %v681_v29 = vpop.f32.mrb[1].mxu0 }
 0x107   : > { %v796_v30 = vadd.f32 %v453_v28, %v206_v24 }
 0x108   : > { %v795_v31 = vadd.f32 %v794_v27, %v679_v26 }
 0x109   : > { %v797_v32 = vadd.f32 %v796_v30, %v681_v29 }
 0x10a   : > { %684 = vst [vmem:[%s188_s11] sm:$0xff] %v795_v31 }
 0x10b   : > { %685 = vst [vmem:[%s188_s11 + $0x8] sm:$0xff] %v797_v32 }
 0x10c   : > { %878 = shalt.err (!%p875_p5)
}
 0x10d   : > { %s879_s30 = scalar_lea.hbm %s1039_s23, 256  ;;  %s883_s6 = scalar_lea.hbm %s1089_s3, 512 }
 0x10e   : > { %p880_p6 = scmp.ne.s32.totalorder %s1039_s23, %s879_s30  ;;  %p884_p10 = scmp.lt.u32.totalorder %s1039_s23, %s1089_s3 }
 0x10f   : > { %p885_p11 = scmp.lt.u32.totalorder %s883_s6, %s879_s30  ;;  %p887_p13 = scmp.lt.u32.totalorder %s879_s30, %s1039_s23 }
 0x110   : > { %p881_p7 = pnand %p880_p6, %p1008_p4 }
 0x111   : > { %p886_p12 = por %p885_p11, %p884_p10 }
 0x112   : > { %p882_p9 = pneg %p881_p7 }
 0x113   : > { %p888_p0 = por %p887_p13, %p886_p12 }
 0x115   : > { %p889_p1 = pnand %p888_p0, %p882_p9 }
 0x117   : > { %892 = shalt.err (!%p889_p1)
}
 0x118   : > { %806 = dma.vmem_to_hbm [thread:$0]  (%p1008_p4), %s1041_s18, 256, %s1039_s23, %s687_s26  }
 0x119 PF: > { %p812_p2 = scmp.ge.s32.totalorder %s943_s17, 2  ;;  %s715_s9 = sand.u32 1, %s923_s12  }
 0x11a   : > { %s716_s10 = scalar_lea.sflag [#allocation3], %s715_s9 }
 0x11b   : > { %p809_p3 = pnand %p812_p2, %p1015_p8 }
 0x11d   : > { %918 = dma.done.wait (!%p809_p3), %s716_s10, 256  }
 0x11e   : > { %920 = vsyncadd (!%p809_p3), %s716_s10, 4294967040  ;;  %s16_s17 = sadd.s32 1, %s943_s17   ;;  %s1092_s12 = smov %s927_s13 }
 0x11f   : > { %p13_p5 = scmp.ge.s32.totalorder %s16_s17, 4   ;;  %s1093_s13 = smov %s931_s14 }
 0x120   : > { %s1094_s14 = smov %s1021_s25  ;;  %s1095_s15 = smov %s939_s16 }
 0x121   : > { %s1096_s16 = smov %s1098_s20  ;;  %15 = sbr.rel (!%p13_p5) target bundleno = 4 (0x4), region = 67 }
 0x128   :  { %721 = vsyncpa [#allocation3], 1 }
 0x129   :  { %723 = vsyncpa [#allocation3 + $0x1], 1 }

</bundles_post_ra>
